<compile_context>
chip_gen: v5e
topology: v5e:2x2
jax: 0.10.0
libtpu: 0.0.40
codegen_flags: <defaults>
</compile_context>

<pallas_src>
import jax
import jax.numpy as jnp
from jax.experimental import pallas as pl
from jax.experimental.pallas import tpu as pltpu

_MAX_TB = 2048      # max batch (lane) tile per grid step; VMEM use stays < 1 MiB
_LANE_CHUNK = 512   # in-kernel sub-chunk along lanes; keeps activations in vregs


def mlp_dqn_kernel(x_ref, w1_ref, b1_ref, w2_ref, b2_ref,
                   w3_ref, b3_ref, w4_ref, b4_ref, o_ref):
    # Weights/biases are VMEM-resident (same block every grid step); load once.
    w1 = w1_ref[...]; b1 = b1_ref[...]
    w2 = w2_ref[...]; b2 = b2_ref[...]
    w3 = w3_ref[...]; b3 = b3_ref[...]
    w4 = w4_ref[...]; b4 = b4_ref[...]
    cd = x_ref.dtype  # matmul-input dtype (bf16 by default; f32 also supported)

    def chain(xt):
        # y^T = W4 @ relu(W3 @ relu(W2 @ relu(W1 @ x^T + b1) + b2) + b3) + b4
        # MXU accumulates in f32; bias-add / ReLU in f32 (v5e has no bf16 VPU).
        h = jnp.maximum(jnp.dot(w1, xt, preferred_element_type=jnp.float32) + b1, 0.0)
        h = jnp.maximum(jnp.dot(w2, h.astype(cd), preferred_element_type=jnp.float32) + b2, 0.0)
        h = jnp.maximum(jnp.dot(w3, h.astype(cd), preferred_element_type=jnp.float32) + b3, 0.0)
        return jnp.dot(w4, h.astype(cd), preferred_element_type=jnp.float32) + b4

    # Static (fully unrolled, all-static slices) sub-chunk loop over the lane
    # (batch) axis: each chunk's activations stay resident in vregs, avoiding
    # VMEM spills of inter-layer intermediates at large TB.
    tb = x_ref.shape[1]
    for start in range(0, tb, _LANE_CHUNK):
        end = min(start + _LANE_CHUNK, tb)       # all offsets multiples of 128
        o_ref[:, start:end] = chain(x_ref[:, start:end])


def _round_up(v, m):
    return ((v + m - 1) // m) * m


def _choose_tiling(batch):
    """Pick (TB, num_tiles): a single 128-aligned tile when it fits, otherwise an
    even number of tiles (balanced across v7x's two TensorCores)."""
    b128 = _round_up(max(batch, 1), 128)
    if b128 <= _MAX_TB:
        return b128, 1
    n = -(-batch // _MAX_TB)
    if n % 2:
        n += 1
    tb = _round_up(-(-batch // n), 128)
    n = -(-batch // tb)
    if n > 1 and n % 2:
        n += 1
    return tb, n


def mlp_dqn_forward(x, params, compute_dtype=jnp.bfloat16):
    """x: (B, input_dim). params: w1..w4 as (out, in) [PyTorch layout], b1..b4 as (out, 1)."""
    batch, input_dim = x.shape
    out_dim = params["w4"].shape[0]

    tb, num_tiles = _choose_tiling(batch)
    b_pad = tb * num_tiles

    # x.float() semantics, then transpose so batch rides the lane axis.  Matmul
    # inputs are streamed as compute_dtype (bf16 halves the dominant x DMA).
    x_t = x.astype(jnp.float32).T
    if b_pad != batch:
        x_t = jnp.pad(x_t, ((0, 0), (0, b_pad - batch)))
    x_t = x_t.astype(compute_dtype)

    weight_args = (params["w1"].astype(compute_dtype), params["b1"],
                   params["w2"].astype(compute_dtype), params["b2"],
                   params["w3"].astype(compute_dtype), params["b3"],
                   params["w4"].astype(compute_dtype), params["b4"])

    def resident_spec(shape):
        # Full-array block, same block index every step -> DMA'd once, VMEM-resident.
        return pl.BlockSpec(shape, lambda i: (0, 0))

    out_t = pl.pallas_call(
        mlp_dqn_kernel,
        out_shape=jax.ShapeDtypeStruct((out_dim, b_pad), jnp.float32),
        grid=(num_tiles,),
        in_specs=[pl.BlockSpec((input_dim, tb), lambda i: (0, i))]
                 + [resident_spec(a.shape) for a in weight_args],
        out_specs=pl.BlockSpec((out_dim, tb), lambda i: (0, i)),
        compiler_params=pltpu.CompilerParams(
            dimension_semantics=("parallel",)),  # batch tiles shard across TCs on v7x
    )(x_t, *weight_args)

    # Padded batch columns are computed but discarded here.
    return out_t.T[:batch]


def init_params(key, input_dim, output_dim, n_units=24):
    """PyTorch-Linear-style uniform(-1/sqrt(fan_in), +1/sqrt(fan_in)) init.
    Weights stored as (out_features, in_features); biases as (out_features, 1)."""
    dims = [(input_dim, n_units), (n_units, n_units), (n_units, n_units), (n_units, output_dim)]
    params = {}
    for i, (fan_in, fan_out) in enumerate(dims, start=1):
        key, kw, kb = jax.random.split(key, 3)
        bound = 1.0 / float(fan_in) ** 0.5
        params[f"w{i}"] = jax.random.uniform(kw, (fan_out, fan_in), jnp.float32, -bound, bound)
        params[f"b{i}"] = jax.random.uniform(kb, (fan_out, 1), jnp.float32, -bound, bound)
    return params


def reference_forward(x, params):
    """Pure-JAX f32 reference matching the PyTorch module semantics."""
    h = x.astype(jnp.float32)
    for i in (1, 2, 3):
        h = jnp.maximum(h @ params[f"w{i}"].T + params[f"b{i}"].reshape(1, -1), 0.0)
    return h @ params["w4"].T + params["b4"].reshape(1, -1)


if __name__ == "__main__":
    key = jax.random.PRNGKey(0)
    input_dim, output_dim, n_units = 16, 4, 24
    params = init_params(key, input_dim, output_dim, n_units)

    # bf16 matmul inputs vs f32 reference -> loose tolerance.
    tol = dict(atol=3e-2, rtol=3e-2)

    # Small batch: single 128-lane tile, single grid step.
    key, kx = jax.random.split(key)
    x_small = jax.random.normal(kx, (8, input_dim), jnp.float32)
    out_small = jax.block_until_ready(mlp_dqn_forward(x_small, params))
    assert out_small.shape == (8, output_dim)
    assert jnp.allclose(out_small, reference_forward(x_small, params), **tol), "small-batch mismatch"

    # Moderate batch (600): single grid step of TB=640 (previously 3 steps + 168 pad rows).
    key, kx2 = jax.random.split(key)
    x_mid = jax.random.normal(kx2, (600, input_dim), jnp.float32)
    out_mid = jax.block_until_ready(mlp_dqn_forward(x_mid, params))
    assert out_mid.shape == (600, output_dim)
    assert jnp.allclose(out_mid, reference_forward(x_mid, params), **tol), "mid-batch mismatch"

    # Large batch (5000): exercises the multi-tile path (4 even tiles of 1280).
    key, kx3 = jax.random.split(key)
    x_big = jax.random.normal(kx3, (5000, input_dim), jnp.float32)
    out_big = jax.block_until_ready(mlp_dqn_forward(x_big, params))
    assert out_big.shape == (5000, output_dim)
    assert jnp.allclose(out_big, reference_forward(x_big, params), **tol), "large-batch mismatch"

    # Exact-precision path: f32 compute must match the f32 reference tightly.
    out_f32 = jax.block_until_ready(mlp_dqn_forward(x_mid, params, compute_dtype=jnp.float32))
    assert jnp.allclose(out_f32, reference_forward(x_mid, params), atol=1e-4, rtol=1e-4), "f32-path mismatch"

    print("KERNEL_OK")
</pallas_src>

<mosaic_0001>
module attributes {stable_mosaic.version = 11 : i64} {
  func.func @mlp_dqn_kernel(%arg0: i32, %arg1: memref<16x128xbf16, #tpu.memory_space<vmem>>, %arg2: memref<24x16xbf16, #tpu.memory_space<vmem>>, %arg3: memref<24x1xf32, #tpu.memory_space<vmem>>, %arg4: memref<24x24xbf16, #tpu.memory_space<vmem>>, %arg5: memref<24x1xf32, #tpu.memory_space<vmem>>, %arg6: memref<24x24xbf16, #tpu.memory_space<vmem>>, %arg7: memref<24x1xf32, #tpu.memory_space<vmem>>, %arg8: memref<4x24xbf16, #tpu.memory_space<vmem>>, %arg9: memref<4x1xf32, #tpu.memory_space<vmem>>, %arg10: memref<4x128xf32, #tpu.memory_space<vmem>>) attributes {dimension_semantics = [#tpu.dimension_semantics<parallel>], iteration_bounds = array<i64: 1>, scalar_prefetch = 0 : i64, scratch_operands = 0 : i64, tpu.core_type = #tpu.core_type<tc>, window_params = [{transform_indices = @transform_0, window_bounds = array<i64: 16, 128>}, {pipeline_mode = #tpu.pipeline_mode<synchronous>, transform_indices = @transform_1, window_bounds = array<i64: 24, 16>}, {pipeline_mode = #tpu.pipeline_mode<synchronous>, transform_indices = @transform_2, window_bounds = array<i64: 24, 1>}, {pipeline_mode = #tpu.pipeline_mode<synchronous>, transform_indices = @transform_3, window_bounds = array<i64: 24, 24>}, {pipeline_mode = #tpu.pipeline_mode<synchronous>, transform_indices = @transform_4, window_bounds = array<i64: 24, 1>}, {pipeline_mode = #tpu.pipeline_mode<synchronous>, transform_indices = @transform_5, window_bounds = array<i64: 24, 24>}, {pipeline_mode = #tpu.pipeline_mode<synchronous>, transform_indices = @transform_6, window_bounds = array<i64: 24, 1>}, {pipeline_mode = #tpu.pipeline_mode<synchronous>, transform_indices = @transform_7, window_bounds = array<i64: 4, 24>}, {pipeline_mode = #tpu.pipeline_mode<synchronous>, transform_indices = @transform_8, window_bounds = array<i64: 4, 1>}, {transform_indices = @transform_9, window_bounds = array<i64: 4, 128>}]} {
    %c0 = arith.constant 0 : index
    %c0_0 = arith.constant 0 : index
    %0 = vector.load %arg2[%c0, %c0_0] : memref<24x16xbf16, #tpu.memory_space<vmem>>, vector<24x16xbf16>
    %c0_1 = arith.constant 0 : index
    %c0_2 = arith.constant 0 : index
    %1 = vector.load %arg3[%c0_1, %c0_2] : memref<24x1xf32, #tpu.memory_space<vmem>>, vector<24x1xf32>
    %c0_3 = arith.constant 0 : index
    %c0_4 = arith.constant 0 : index
    %2 = vector.load %arg4[%c0_3, %c0_4] : memref<24x24xbf16, #tpu.memory_space<vmem>>, vector<24x24xbf16>
    %c0_5 = arith.constant 0 : index
    %c0_6 = arith.constant 0 : index
    %3 = vector.load %arg5[%c0_5, %c0_6] : memref<24x1xf32, #tpu.memory_space<vmem>>, vector<24x1xf32>
    %c0_7 = arith.constant 0 : index
    %c0_8 = arith.constant 0 : index
    %4 = vector.load %arg6[%c0_7, %c0_8] : memref<24x24xbf16, #tpu.memory_space<vmem>>, vector<24x24xbf16>
    %c0_9 = arith.constant 0 : index
    %c0_10 = arith.constant 0 : index
    %5 = vector.load %arg7[%c0_9, %c0_10] : memref<24x1xf32, #tpu.memory_space<vmem>>, vector<24x1xf32>
    %c0_11 = arith.constant 0 : index
    %c0_12 = arith.constant 0 : index
    %6 = vector.load %arg8[%c0_11, %c0_12] : memref<4x24xbf16, #tpu.memory_space<vmem>>, vector<4x24xbf16>
    %c0_13 = arith.constant 0 : index
    %c0_14 = arith.constant 0 : index
    %7 = vector.load %arg9[%c0_13, %c0_14] : memref<4x1xf32, #tpu.memory_space<vmem>>, vector<4x1xf32>
    %c0_15 = arith.constant 0 : index
    %c0_16 = arith.constant 0 : index
    %8 = vector.load %arg1[%c0_15, %c0_16] : memref<16x128xbf16, #tpu.memory_space<vmem>>, vector<16x128xbf16>
    %cst = arith.constant dense<0.000000e+00> : vector<24x128xf32>
    %9 = tpu.matmul %0, %8, %cst {dimension_numbers = #tpu.dot_dimension_numbers<[1], [0], [0], [1], [0, 0, 1, 1], [], []>} : vector<24x16xbf16>, vector<16x128xbf16>, vector<24x128xf32> -> vector<24x128xf32>
    %10 = vector.broadcast %1 : vector<24x1xf32> to vector<24x128xf32>
    %11 = arith.addf %9, %10 : vector<24x128xf32>
    %cst_17 = arith.constant 0.000000e+00 : f32
    %12 = vector.broadcast %cst_17 : f32 to vector<24x128xf32>
    %13 = arith.maximumf %11, %12 : vector<24x128xf32>
    %14 = arith.truncf %13 : vector<24x128xf32> to vector<24x128xbf16>
    %cst_18 = arith.constant dense<0.000000e+00> : vector<24x128xf32>
    %15 = tpu.matmul %2, %14, %cst_18 {dimension_numbers = #tpu.dot_dimension_numbers<[1], [0], [0], [1], [0, 0, 1, 1], [], []>} : vector<24x24xbf16>, vector<24x128xbf16>, vector<24x128xf32> -> vector<24x128xf32>
    %16 = vector.broadcast %3 : vector<24x1xf32> to vector<24x128xf32>
    %17 = arith.addf %15, %16 : vector<24x128xf32>
    %cst_19 = arith.constant 0.000000e+00 : f32
    %18 = vector.broadcast %cst_19 : f32 to vector<24x128xf32>
    %19 = arith.maximumf %17, %18 : vector<24x128xf32>
    %20 = arith.truncf %19 : vector<24x128xf32> to vector<24x128xbf16>
    %cst_20 = arith.constant dense<0.000000e+00> : vector<24x128xf32>
    %21 = tpu.matmul %4, %20, %cst_20 {dimension_numbers = #tpu.dot_dimension_numbers<[1], [0], [0], [1], [0, 0, 1, 1], [], []>} : vector<24x24xbf16>, vector<24x128xbf16>, vector<24x128xf32> -> vector<24x128xf32>
    %22 = vector.broadcast %5 : vector<24x1xf32> to vector<24x128xf32>
    %23 = arith.addf %21, %22 : vector<24x128xf32>
    %cst_21 = arith.constant 0.000000e+00 : f32
    %24 = vector.broadcast %cst_21 : f32 to vector<24x128xf32>
    %25 = arith.maximumf %23, %24 : vector<24x128xf32>
    %26 = arith.truncf %25 : vector<24x128xf32> to vector<24x128xbf16>
    %cst_22 = arith.constant dense<0.000000e+00> : vector<4x128xf32>
    %27 = tpu.matmul %6, %26, %cst_22 {dimension_numbers = #tpu.dot_dimension_numbers<[1], [0], [0], [1], [0, 0, 1, 1], [], []>} : vector<4x24xbf16>, vector<24x128xbf16>, vector<4x128xf32> -> vector<4x128xf32>
    %28 = vector.broadcast %7 : vector<4x1xf32> to vector<4x128xf32>
    %29 = arith.addf %27, %28 : vector<4x128xf32>
    %c0_23 = arith.constant 0 : index
    %c0_24 = arith.constant 0 : index
    %30 = vector.load %arg10[%c0_23, %c0_24] : memref<4x128xf32, #tpu.memory_space<vmem>>, vector<4x128xf32>
    tpu.vector_store %arg10[%c0_23, %c0_24], %29 {strides = array<i32>} : memref<4x128xf32, #tpu.memory_space<vmem>>, vector<4x128xf32>,
    return
  }
  func.func @transform_0(%arg0: i32) -> (i32, i32) {
    %c0_i32 = arith.constant 0 : i32
    %c0_i32_0 = arith.constant 0 : i32
    return %c0_i32, %arg0 : i32, i32
  }
  func.func @transform_1(%arg0: i32) -> (i32, i32) {
    %c0_i32 = arith.constant 0 : i32
    %c0_i32_0 = arith.constant 0 : i32
    %c0_i32_1 = arith.constant 0 : i32
    return %c0_i32, %c0_i32_0 : i32, i32
  }
  func.func @transform_2(%arg0: i32) -> (i32, i32) {
    %c0_i32 = arith.constant 0 : i32
    %c0_i32_0 = arith.constant 0 : i32
    %c0_i32_1 = arith.constant 0 : i32
    return %c0_i32, %c0_i32_0 : i32, i32
  }
  func.func @transform_3(%arg0: i32) -> (i32, i32) {
    %c0_i32 = arith.constant 0 : i32
    %c0_i32_0 = arith.constant 0 : i32
    %c0_i32_1 = arith.constant 0 : i32
    return %c0_i32, %c0_i32_0 : i32, i32
  }
  func.func @transform_4(%arg0: i32) -> (i32, i32) {
    %c0_i32 = arith.constant 0 : i32
    %c0_i32_0 = arith.constant 0 : i32
    %c0_i32_1 = arith.constant 0 : i32
    return %c0_i32, %c0_i32_0 : i32, i32
  }
  func.func @transform_5(%arg0: i32) -> (i32, i32) {
    %c0_i32 = arith.constant 0 : i32
    %c0_i32_0 = arith.constant 0 : i32
    %c0_i32_1 = arith.constant 0 : i32
    return %c0_i32, %c0_i32_0 : i32, i32
  }
  func.func @transform_6(%arg0: i32) -> (i32, i32) {
    %c0_i32 = arith.constant 0 : i32
    %c0_i32_0 = arith.constant 0 : i32
    %c0_i32_1 = arith.constant 0 : i32
    return %c0_i32, %c0_i32_0 : i32, i32
  }
  func.func @transform_7(%arg0: i32) -> (i32, i32) {
    %c0_i32 = arith.constant 0 : i32
    %c0_i32_0 = arith.constant 0 : i32
    %c0_i32_1 = arith.constant 0 : i32
    return %c0_i32, %c0_i32_0 : i32, i32
  }
  func.func @transform_8(%arg0: i32) -> (i32, i32) {
    %c0_i32 = arith.constant 0 : i32
    %c0_i32_0 = arith.constant 0 : i32
    %c0_i32_1 = arith.constant 0 : i32
    return %c0_i32, %c0_i32_0 : i32, i32
  }
  func.func @transform_9(%arg0: i32) -> (i32, i32) {
    %c0_i32 = arith.constant 0 : i32
    %c0_i32_0 = arith.constant 0 : i32
    return %c0_i32, %arg0 : i32, i32
  }
}

</mosaic_0001>

<bundles_post_ra>
// kernel: tpu_custom_call.1
= control target key start
LH: loop header
LB: loop body
LE: loop exit
PB: predicated region body
PF: predicated region fallthrough
CT: control target
= control target key end

     0   :  { %v326_v2 = vmov 0   ;;  %vm85_vm0 = vcmask 130048   ;;  %s445_s0 = inlined_call_operand.vmem [shape: bf16[16,128], index: 0, kind: input, shape index: {}]   ;;  %s446_s1 = inlined_call_operand.vmem [shape: bf16[24,16], index: 1, kind: input, shape index: {}]   ;;  %s447_s2 = inlined_call_operand.vmem [shape: f32[24,1], index: 2, kind: input, shape index: {}]   ;;  %s448_s3 = inlined_call_operand.vmem [shape: bf16[24,24], index: 3, kind: input, shape index: {}]   ;;  %s449_s4 = inlined_call_operand.vmem [shape: f32[24,1], index: 4, kind: input, shape index: {}]   ;;  %s450_s5 = inlined_call_operand.vmem [shape: bf16[24,24], index: 5, kind: input, shape index: {}]   ;;  %s451_s6 = inlined_call_operand.vmem [shape: f32[24,1], index: 6, kind: input, shape index: {}]   ;;  %s452_s7 = inlined_call_operand.vmem [shape: bf16[4,24], index: 7, kind: input, shape index: {}]   ;;  %s453_s8 = inlined_call_operand.vmem [shape: f32[4,1], index: 8, kind: input, shape index: {}]   ;;  %s454_s9 = inlined_call_operand.hbm [shape: f32[4,128], index: 9, kind: output, shape index: {}]  }
   0x1   :  { %v294_v0 = vld [vmem:[%s445_s0] sm:$0xff]  ;;  %v39_v1 = vld [vmem:[%s447_s2 + $0x10] sm:$0xff]  ;;  %297 = vset.pattern.permute.xlu0 %v326_v2  ;;  %298 = vset.pattern.permute.xlu1 %v326_v2  ;;  %v38_v4 = vld [vmem:[%s447_s2 + $0x8] sm:$0xff] }
   0x2   :  { %v291_v3 = vld [vmem:[%s446_s1] sm:$0xff]  ;;  %99 = vmatpush.bf16.msra.mxu0 %v294_v0  ;;  %68 = vperm.xlu0 %297, %v39_v1  }
   0x3   :  { %63 = vperm.xlu1 %298, %v38_v4   ;;  %299 = vset.pattern.permute.xlu2 %v326_v2 }
   0x4   :  { %14 = vsyncpa [#allocation3], 0  ;;  %v37_v5 = vld [vmem:[%s447_s2] sm:$0xff]  ;;  %v45_v6 = vld [vmem:[%s449_s4 + $0x10] sm:$0xff]  ;;  %vm145_vm1 = vcmask 1043456   ;;  %vm138_vm2 = vcmask 195584  }
   0x5   :  { %276 = vmatmul.msk.bf16.vlgmr.msra.gmra.mxu0 %vm85_vm0, %v291_v3  ;;  %v36_v7 = vld [vmem:[%s446_s1 + $0x8] sm:$0xf]  ;;  %v51_v9 = vld [vmem:[%s451_s6 + $0x10] sm:$0xff]  ;;  %v49_v10 = vld [vmem:[%s451_s6] sm:$0xff]  ;;  %s327_s16 = smov [#allocation2]   ;;  %s259_s19 = sshll.u32 %s454_s9, 4  ;;  %s260_s19 = int_to_ptr.hbm [resolvable:$true] %s259_s19 }
   0x6   :  { %v76_v8 = vunpack.c.l.b16 %v36_v7  ;;  %v53_v12 = vld [vmem:[%s453_s8] sm:$0xf]  ;;  %v44_v25 = vld [vmem:[%s449_s4 + $0x8] sm:$0xff]  ;;  %s257_s0 = sshll.u32 %s327_s16, 4  ;;  %s258_s0 = int_to_ptr.vmem [resolvable:$true] %s257_s0 }
   0x7   :  { %v43_v16 = vld [vmem:[%s449_s4] sm:$0xff]  ;;  %v50_v32 = vld [vmem:[%s451_s6 + $0x8] sm:$0xff] }
   0x8   :  { %v78_v11 = vpack.c.b16 %v76_v8, %v76_v8  ;;  %117 = vperm.xlu2 %299, %v43_v16   ;;  %v292_v31 = vld [vmem:[%s448_s3] sm:$0xff]  ;;  %v42_v33 = vld [vmem:[%s448_s3 + $0x8] sm:$0xf] }
   0x9   :  { %v135_v34 = vunpack.c.l.b16 %v42_v33  ;;  %v293_v52 = vld [vmem:[%s450_s5] sm:$0xff]  ;;  %v48_v53 = vld [vmem:[%s450_s5 + $0x8] sm:$0xf] }
   0xa   :  { %58 = vperm.xlu0 %297, %v37_v5   ;;  %v192_v54 = vunpack.c.l.b16 %v48_v53  ;;  %v52_v8 = vld [vmem:[%s452_s7] sm:$0x3] }
   0xb   :  { %127 = vperm.xlu1 %298, %v45_v6   ;;  %v137_v35 = vpack.c.b16 %v135_v34, %v135_v34 }
   0xc   :  { %v194_v55 = vpack.c.b16 %v192_v54, %v192_v54 }
  0x10   :  { %122 = vperm.xlu2 %299, %v44_v25  }
  0x12   :  { %184 = vperm.xlu0 %297, %v51_v9  }
  0x13   :  { %174 = vperm.xlu1 %298, %v49_v10  }
  0x15   :  { %277 = vmatmul.msk.bf16.gmra.mxu0 %vm85_vm0, %v78_v11 }
  0x18   :  { %179 = vperm.xlu2 %299, %v50_v32  }
  0x1a   :  { %229 = vperm.xlu0 %297, %v53_v12  }
  0x62   :  { %v118_v37 = vpop.permute.xlu2 %117 }
  0x6a   :  { %v123_v41 = vpop.permute.xlu2 %122 }
  0x72   :  { %v180_v60 = vpop.permute.xlu2 %179 }
  0x74   :  { %v69_v15 = vpop.permute.xlu0 %68 }
  0x75   :  { %v64_v18 = vpop.permute.xlu1 %63 }
  0x7c   :  { %v59_v21 = vpop.permute.xlu0 %58 }
  0x7d   :  { %v128_v39 = vpop.permute.xlu1 %127 }
  0x82   :  { %v101_v13 = vpop.f32.mrf.mxu0 }
  0x83   :  { %v102_v23 = vadd.f32 %v101_v13, %v59_v21 }
  0x84   :  { %v185_v58 = vpop.permute.xlu0 %184 }
  0x85   :  { %v110_v28 = vmax.f32 %v102_v23, 0.0  ;;  %v175_v63 = vpop.permute.xlu1 %174 }
  0x8a   :  { %v103_v14 = vpop.f32.mrf.mxu0 }
  0x8b   :  { %v104_v20 = vadd.f32 %v103_v14, %v64_v18 }
  0x8c   :  { %v230_v9 = vpop.permute.xlu0 %229 }
  0x8d   :  { %v111_v26 = vmax.f32 %v104_v20, 0.0 }
  0x8f   :  { %v113_v30 = vpack.c.bf16 %v111_v26, %v110_v28 }
  0x92   :  { %v106_v17 = vpop.f32.mrf.mxu0 }
  0x93   :  { %v107_v19 = vadd.f32 %v106_v17, %v69_v15 }
  0x95   :  { %v112_v22 = vmax.f32 %v107_v19, 0.0 }
  0x97   :  { %v114_v24 = vpack.c.bf16 %v112_v22, %v112_v22 }
  0x99   :  { %v147_v27 = vsel %vm145_vm1, %v114_v24, 0 }
  0x9a   :  { %v108_v29 = vpop.f32.mrf.mxu0  ;;  %155 = vmatpush.bf16.msra.mxu1 %v147_v27 }
  0x9e   :  { %156 = vmatpush.bf16.msra.mxu1 %v113_v30 }
  0xa1   :  { %282 = vmatmul.msk.bf16.vlgmr.msra.gmra.mxu1 %vm138_vm2, %v292_v31 }
  0xb1   :  { %283 = vmatmul.msk.bf16.gmra.mxu1 %vm138_vm2, %v137_v35 }
 0x11e   :  { %v158_v36 = vpop.f32.mrf.mxu1 }
 0x11f   :  { %v159_v45 = vadd.f32 %v158_v36, %v118_v37 }
 0x121   :  { %v167_v49 = vmax.f32 %v159_v45, 0.0 }
 0x126   :  { %v160_v38 = vpop.f32.mrf.mxu1 }
 0x127   :  { %v161_v43 = vadd.f32 %v160_v38, %v123_v41 }
 0x129   :  { %v168_v47 = vmax.f32 %v161_v43, 0.0 }
 0x12b   :  { %v170_v51 = vpack.c.bf16 %v168_v47, %v167_v49 }
 0x12e   :  { %v163_v40 = vpop.f32.mrf.mxu1 }
 0x12f   :  { %v164_v42 = vadd.f32 %v163_v40, %v128_v39 }
 0x131   :  { %v169_v44 = vmax.f32 %v164_v42, 0.0 }
 0x133   :  { %v171_v46 = vpack.c.bf16 %v169_v44, %v169_v44 }
 0x135   :  { %v202_v48 = vsel %vm145_vm1, %v171_v46, 0 }
 0x136   :  { %v165_v50 = vpop.f32.mrf.mxu1  ;;  %210 = vmatpush.bf16.msra.mxu2 %v202_v48 }
 0x13a   :  { %211 = vmatpush.bf16.msra.mxu2 %v170_v51 }
 0x13d   :  { %288 = vmatmul.msk.bf16.vlgmr.msra.gmra.mxu2 %vm138_vm2, %v293_v52 }
 0x14d   :  { %289 = vmatmul.msk.bf16.gmra.mxu2 %vm138_vm2, %v194_v55 }
 0x1c0   :  { %v213_v56 = vpop.f32.mrf.mxu2 }
 0x1c1   :  { %v214_v1 = vadd.f32 %v213_v56, %v175_v63 }
 0x1c3   :  { %v222_v5 = vmax.f32 %v214_v1, 0.0 }
 0x1c8   :  { %v215_v57 = vpop.f32.mrf.mxu2 }
 0x1c9   :  { %v216_v62 = vadd.f32 %v215_v57, %v180_v60 }
 0x1cb   :  { %v223_v3 = vmax.f32 %v216_v62, 0.0 }
 0x1cd   :  { %v225_v7 = vpack.c.bf16 %v223_v3, %v222_v5 }
 0x1d0   :  { %v218_v59 = vpop.f32.mrf.mxu2 }
 0x1d1   :  { %v219_v61 = vadd.f32 %v218_v59, %v185_v58 }
 0x1d3   :  { %v224_v0 = vmax.f32 %v219_v61, 0.0 }
 0x1d5   :  { %v226_v2 = vpack.c.bf16 %v224_v0, %v224_v0 }
 0x1d7   :  { %v236_v4 = vsel %vm145_vm1, %v226_v2, 0 }
 0x1d8   :  { %v220_v6 = vpop.f32.mrf.mxu2  ;;  %244 = vmatpush.bf16.msra.mxu3 %v236_v4 }
 0x1dc   :  { %245 = vmatpush.bf16.msra.mxu3 %v225_v7 }
 0x1df   :  { %290 = vmatmul.msk.bf16.vlgmr.msra.gmra.mxu3 %vm138_vm2, %v52_v8 }
 0x262   :  { %v247_v10 = vpop.f32.mrf.mxu3 }
 0x263   :  { %v248_v11 = vadd.f32 %v247_v10, %v230_v9 }
 0x265   :  { %251 = vst [vmem:[#allocation2] sm:$0xf] %v248_v11 }
 0x266   :  { %262 = dma.vmem_to_hbm [thread:$0]  %s258_s0, 64, %s260_s19, [#allocation3]  }
 0x26a   :  { %v249_v12 = vpop.f32.mrf.mxu3 }
 0x26b   :  { %324 = dma.done.wait [#allocation3], 64  }
 0x26c   :  { %325 = vsyncadd [#allocation3], 4294967232 }
 0x26d   :  { %267 = vsyncpa [#allocation3], 1 }

</bundles_post_ra>
